<compile_context>
chip_gen: v5e
topology: v5e:2x2
jax: 0.10.0
libtpu: 0.0.40
codegen_flags: <defaults>
</compile_context>

<pallas_src>
import math

import jax
import jax.numpy as jnp
from jax import lax
from jax.experimental import pallas as pl
from jax.experimental.pallas import tpu as pltpu


# ----------------------------------------------------------------------------
# Fused FFN kernel: one row tile per grid step.
# ----------------------------------------------------------------------------
def _ffn_kernel(x_ref, w1_ref, b1_ref, w2_ref, b2_ref, o_ref):
    # Cast the activation tile to the compute dtype (bf16) on the VPU; the
    # HBM stream for x stays in its original dtype (no extra XLA cast pass).
    x = x_ref[...].astype(w1_ref.dtype)                       # (tm, d_model)

    # First linear: contract d_model of x with dim 1 of W1 (PyTorch layout is
    # (d_ff, d_model)) -- no in-kernel transpose, f32 accumulation on the MXU.
    h = lax.dot_general(
        x, w1_ref[...],
        dimension_numbers=(((1,), (1,)), ((), ())),
        preferred_element_type=jnp.float32,
    )                                                         # (tm, d_ff) f32
    h = jnp.maximum(h + b1_ref[...], 0.0)                     # bias + ReLU in f32

    # TODO(synk): training-mode dropout on `h` would go here (eval = identity).

    # Second linear: contract d_ff of h with dim 1 of W2 ((d_model, d_ff)).
    y = lax.dot_general(
        h.astype(w2_ref.dtype), w2_ref[...],
        dimension_numbers=(((1,), (1,)), ((), ())),
        preferred_element_type=jnp.float32,
    )                                                         # (tm, d_model) f32
    o_ref[...] = (y + b2_ref[...]).astype(o_ref.dtype)


def positionwise_feed_forward(x, w1, b1, w2, b2, *, block_rows=256,
                              compute_dtype=jnp.bfloat16):
    """Fused FFN forward.

    x : (..., d_model) float32
    w1: (d_ff, d_model), b1: (d_ff,)      -- PyTorch nn.Linear(d_model, d_ff)
    w2: (d_model, d_ff), b2: (d_model,)   -- PyTorch nn.Linear(d_ff, d_model)
    returns (..., d_model) in x.dtype.
    """
    d_ff, d_model = w1.shape
    assert w2.shape == (d_model, d_ff)

    lead_shape = x.shape[:-1]
    x2 = x.reshape(-1, d_model)
    n = x2.shape[0]

    # Row tile: multiple of 8 (sublane), capped at block_rows.  Remainder
    # blocks are handled (padded/masked) by Pallas automatically.
    tm = min(block_rows, max(8, ((n + 7) // 8) * 8))

    # Weights cast to the compute dtype once here (tiny, amortized over all
    # row tiles); biases kept in f32 for the f32 epilogue math.
    w1c = w1.astype(compute_dtype)
    w2c = w2.astype(compute_dtype)
    b1r = b1.reshape(1, d_ff).astype(jnp.float32)
    b2r = b2.reshape(1, d_model).astype(jnp.float32)

    out = pl.pallas_call(
        _ffn_kernel,
        out_shape=jax.ShapeDtypeStruct((n, d_model), x.dtype),
        grid=(pl.cdiv(n, tm),),
        in_specs=[
            pl.BlockSpec((tm, d_model), lambda i: (i, 0)),    # x row tile (pipelined)
            pl.BlockSpec((d_ff, d_model), lambda i: (0, 0)),  # W1 (resident)
            pl.BlockSpec((1, d_ff), lambda i: (0, 0)),        # b1 (resident)
            pl.BlockSpec((d_model, d_ff), lambda i: (0, 0)),  # W2 (resident)
            pl.BlockSpec((1, d_model), lambda i: (0, 0)),     # b2 (resident)
        ],
        out_specs=pl.BlockSpec((tm, d_model), lambda i: (i, 0)),
        compiler_params=pltpu.CompilerParams(
            dimension_semantics=("parallel",),
            vmem_limit_bytes=32 * 1024 * 1024,
        ),
    )(x2, w1c, b1r, w2c, b2r)

    return out.reshape(*lead_shape, d_model)


# ----------------------------------------------------------------------------
# References (plain JAX) for sanity checking.
# ----------------------------------------------------------------------------
def reference_ffn_f32(x, w1, b1, w2, b2):
    h = jnp.maximum(x @ w1.T + b1, 0.0)
    return h @ w2.T + b2


def reference_ffn_bf16(x, w1, b1, w2, b2):
    """Same precision recipe as the kernel (bf16 operands, f32 accumulation)."""
    shp = x.shape
    x2 = x.reshape(-1, shp[-1]).astype(jnp.bfloat16)
    h = lax.dot_general(x2, w1.astype(jnp.bfloat16),
                        dimension_numbers=(((1,), (1,)), ((), ())),
                        preferred_element_type=jnp.float32)
    h = jnp.maximum(h + b1.reshape(1, -1), 0.0)
    y = lax.dot_general(h.astype(jnp.bfloat16), w2.astype(jnp.bfloat16),
                        dimension_numbers=(((1,), (1,)), ((), ())),
                        preferred_element_type=jnp.float32)
    y = y + b2.reshape(1, -1)
    return y.reshape(*shp[:-1], w2.shape[0])


if __name__ == "__main__":
    # Small shapes consistent with the module: batch=2, seq=8, d_model=32, d_ff=128.
    B, S, d_model, d_ff = 2, 8, 32, 128

    key0 = jax.random.PRNGKey(0)
    kx, k1, k2, k3, k4 = jax.random.split(key0, 5)

    # PyTorch nn.Linear default init: U(-1/sqrt(fan_in), 1/sqrt(fan_in)).
    s1 = 1.0 / math.sqrt(d_model)
    s2 = 1.0 / math.sqrt(d_ff)
    w1 = jax.random.uniform(k1, (d_ff, d_model), jnp.float32, -s1, s1)
    b1 = jax.random.uniform(k2, (d_ff,), jnp.float32, -s1, s1)
    w2 = jax.random.uniform(k3, (d_model, d_ff), jnp.float32, -s2, s2)
    b2 = jax.random.uniform(k4, (d_model,), jnp.float32, -s2, s2)

    x = jax.random.normal(kx, (B, S, d_model), jnp.float32)

    # block_rows=8 at this toy size exercises a multi-block parallel grid
    # (grid=(2,), both TensorCores on v7x); the default 256 is for real sizes.
    out = positionwise_feed_forward(x, w1, b1, w2, b2, block_rows=8)
    out = jax.block_until_ready(out)

    assert out.shape == (B, S, d_model)

    # Tight check vs a reference using the same bf16/f32 precision recipe.
    ref_match = reference_ffn_bf16(x, w1, b1, w2, b2)
    assert jnp.allclose(out, ref_match, atol=2e-3, rtol=2e-3), \
        "mismatch vs bf16-matched reference"

    # Looser check vs the pure-f32 module semantics (bf16 rounding of operands).
    ref_f32 = reference_ffn_f32(x, w1, b1, w2, b2)
    assert jnp.allclose(out, ref_f32, atol=5e-2, rtol=5e-2), \
        "mismatch vs f32 reference"

    print("KERNEL_OK")
</pallas_src>

<mosaic_0001>
module attributes {stable_mosaic.version = 11 : i64} {
  func.func @_ffn_kernel(%arg0: i32, %arg1: memref<8x32xf32, #tpu.memory_space<vmem>>, %arg2: memref<128x32xbf16, #tpu.memory_space<vmem>>, %arg3: memref<1x128xf32, #tpu.memory_space<vmem>>, %arg4: memref<32x128xbf16, #tpu.memory_space<vmem>>, %arg5: memref<1x32xf32, #tpu.memory_space<vmem>>, %arg6: memref<8x32xf32, #tpu.memory_space<vmem>>) attributes {dimension_semantics = [#tpu.dimension_semantics<parallel>], iteration_bounds = array<i64: 2>, scalar_prefetch = 0 : i64, scratch_operands = 0 : i64, tpu.core_type = #tpu.core_type<tc>, window_params = [{transform_indices = @transform_0, window_bounds = array<i64: 8, 32>}, {pipeline_mode = #tpu.pipeline_mode<synchronous>, transform_indices = @transform_1, window_bounds = array<i64: 128, 32>}, {pipeline_mode = #tpu.pipeline_mode<synchronous>, transform_indices = @transform_2, window_bounds = array<i64: 1, 128>}, {pipeline_mode = #tpu.pipeline_mode<synchronous>, transform_indices = @transform_3, window_bounds = array<i64: 32, 128>}, {pipeline_mode = #tpu.pipeline_mode<synchronous>, transform_indices = @transform_4, window_bounds = array<i64: 1, 32>}, {transform_indices = @transform_5, window_bounds = array<i64: 8, 32>}]} {
    %c0 = arith.constant 0 : index
    %c0_0 = arith.constant 0 : index
    %0 = vector.load %arg1[%c0, %c0_0] : memref<8x32xf32, #tpu.memory_space<vmem>>, vector<8x32xf32>
    %1 = arith.truncf %0 : vector<8x32xf32> to vector<8x32xbf16>
    %c0_1 = arith.constant 0 : index
    %c0_2 = arith.constant 0 : index
    %2 = vector.load %arg2[%c0_1, %c0_2] : memref<128x32xbf16, #tpu.memory_space<vmem>>, vector<128x32xbf16>
    %cst = arith.constant dense<0.000000e+00> : vector<8x128xf32>
    %3 = tpu.matmul %1, %2, %cst {dimension_numbers = #tpu.dot_dimension_numbers<[1], [1], [0], [0], [0, 0, 1, 0], [], []>} : vector<8x32xbf16>, vector<128x32xbf16>, vector<8x128xf32> -> vector<8x128xf32>
    %c0_3 = arith.constant 0 : index
    %c0_4 = arith.constant 0 : index
    %4 = vector.load %arg3[%c0_3, %c0_4] : memref<1x128xf32, #tpu.memory_space<vmem>>, vector<1x128xf32>
    %5 = vector.broadcast %4 : vector<1x128xf32> to vector<8x128xf32>
    %6 = arith.addf %3, %5 : vector<8x128xf32>
    %cst_5 = arith.constant 0.000000e+00 : f32
    %7 = vector.broadcast %cst_5 : f32 to vector<8x128xf32>
    %8 = arith.maximumf %6, %7 : vector<8x128xf32>
    %9 = arith.truncf %8 : vector<8x128xf32> to vector<8x128xbf16>
    %c0_6 = arith.constant 0 : index
    %c0_7 = arith.constant 0 : index
    %10 = vector.load %arg4[%c0_6, %c0_7] : memref<32x128xbf16, #tpu.memory_space<vmem>>, vector<32x128xbf16>
    %cst_8 = arith.constant dense<0.000000e+00> : vector<8x32xf32>
    %11 = tpu.matmul %9, %10, %cst_8 {dimension_numbers = #tpu.dot_dimension_numbers<[1], [1], [0], [0], [0, 0, 1, 0], [], []>} : vector<8x128xbf16>, vector<32x128xbf16>, vector<8x32xf32> -> vector<8x32xf32>
    %c0_9 = arith.constant 0 : index
    %c0_10 = arith.constant 0 : index
    %12 = vector.load %arg5[%c0_9, %c0_10] : memref<1x32xf32, #tpu.memory_space<vmem>>, vector<1x32xf32>
    %13 = vector.broadcast %12 : vector<1x32xf32> to vector<8x32xf32>
    %14 = arith.addf %11, %13 : vector<8x32xf32>
    %c0_11 = arith.constant 0 : index
    %c0_12 = arith.constant 0 : index
    %15 = vector.load %arg6[%c0_11, %c0_12] : memref<8x32xf32, #tpu.memory_space<vmem>>, vector<8x32xf32>
    tpu.vector_store %arg6[%c0_11, %c0_12], %14 {strides = array<i32>} : memref<8x32xf32, #tpu.memory_space<vmem>>, vector<8x32xf32>,
    return
  }
  func.func @transform_0(%arg0: i32) -> (i32, i32) {
    %c0_i32 = arith.constant 0 : i32
    %c0_i32_0 = arith.constant 0 : i32
    return %arg0, %c0_i32 : i32, i32
  }
  func.func @transform_1(%arg0: i32) -> (i32, i32) {
    %c0_i32 = arith.constant 0 : i32
    %c0_i32_0 = arith.constant 0 : i32
    %c0_i32_1 = arith.constant 0 : i32
    return %c0_i32, %c0_i32_0 : i32, i32
  }
  func.func @transform_2(%arg0: i32) -> (i32, i32) {
    %c0_i32 = arith.constant 0 : i32
    %c0_i32_0 = arith.constant 0 : i32
    %c0_i32_1 = arith.constant 0 : i32
    return %c0_i32, %c0_i32_0 : i32, i32
  }
  func.func @transform_3(%arg0: i32) -> (i32, i32) {
    %c0_i32 = arith.constant 0 : i32
    %c0_i32_0 = arith.constant 0 : i32
    %c0_i32_1 = arith.constant 0 : i32
    return %c0_i32, %c0_i32_0 : i32, i32
  }
  func.func @transform_4(%arg0: i32) -> (i32, i32) {
    %c0_i32 = arith.constant 0 : i32
    %c0_i32_0 = arith.constant 0 : i32
    %c0_i32_1 = arith.constant 0 : i32
    return %c0_i32, %c0_i32_0 : i32, i32
  }
  func.func @transform_5(%arg0: i32) -> (i32, i32) {
    %c0_i32 = arith.constant 0 : i32
    %c0_i32_0 = arith.constant 0 : i32
    return %arg0, %c0_i32 : i32, i32
  }
}

</mosaic_0001>

<bundles_post_ra>
// kernel: tpu_custom_call.1
= control target key start
LH: loop header
LB: loop body
LE: loop exit
PB: predicated region body
PF: predicated region fallthrough
CT: control target
= control target key end

     0   :  { %10 = vsyncpa [#allocation3], 0  ;;  %s762_s0 = inlined_call_operand.vmem [shape: f32[16,32], index: 0, kind: input, shape index: {}]   ;;  %s763_s1 = inlined_call_operand.vmem [shape: bf16[128,32], index: 1, kind: input, shape index: {}]   ;;  %s764_s2 = inlined_call_operand.vmem [shape: f32[1,128], index: 2, kind: input, shape index: {}]   ;;  %s765_s3 = inlined_call_operand.vmem [shape: bf16[32,128], index: 3, kind: input, shape index: {}]   ;;  %s766_s4 = inlined_call_operand.vmem [shape: f32[1,32], index: 4, kind: input, shape index: {}]   ;;  %s767_s5 = inlined_call_operand.hbm [shape: f32[16,32], index: 5, kind: output, shape index: {}]  }
   0x1   :  { %12 = vsyncpa [#allocation3 + $0x1], 0  ;;  %s631_s18 = smov 0   ;;  %s633_s19 = smov 0  }
   0x2   :  { %s635_s20 = smov 0   ;;  %s637_s21 = smov 0  }
   0x3 LB: > { %s652_s22 = sadd.s32 4294967295, %s599_s21   ;;  %s435_s23 = sadd.s32 4294967294, %s599_s21   ;;  %s599_s21 = sphi %s637_s21, %s773_s21   ;;  %s595_s20 = sphi %s635_s20, %s772_s20   ;;  %s591_s19 = sphi %s633_s19, %s771_s19   ;;  %s587_s18 = sphi %s631_s18, %s770_s18  }
   0x4   : > { %s656_s24 = sadd.s32 1, %s599_s21   ;;  %s135_s25 = sadd.s32 1, %s595_s20 }
   0x5   : > { %s132_s26 = ssub.s32 %s599_s21, %s656_s24  ;;  %p145_p0 = scmp.ne.s32.totalorder %s595_s20, %s591_s19 }
   0x6   : > { %p133_p1 = scmp.eq.s32.totalorder %s132_s26, 0  ;;  %p146_p2 = scmp.eq.s32.totalorder %s652_s22, 1 }
   0x7   : > { %p151_p3 = scmp.ne.s32.totalorder %s591_s19, %s587_s18  ;;  %p152_p4 = scmp.eq.s32.totalorder %s435_s23, 1 }
   0x8   : > { %s667_s27 = scalar_select %p133_p1, %s595_s20, %s135_s25  }
   0x9   : > { %p669_p5 = por %p146_p2, %p145_p0  ;;  %p673_p6 = por %p152_p4, %p151_p3 }
   0xa   : > { %p438_p7 = scmp.ge.s32.totalorder %s599_s21, 1  ;;  %p189_p8 = scmp.lt.s32.totalorder %s599_s21, 3 }
   0xc   : > { %p190_p9 = pnand %p438_p7, %p189_p8 }
   0xd   : > { %p216_p10 = scmp.lt.s32.totalorder (!%p190_p9), %s652_s22, 1  ;;  %s213_s16 = sand.u32 (!%p190_p9), 1, %s591_s19  }
   0xe   : > { %193 = sbr.rel (%p190_p9) target bundleno = 350 (0x15e), region = 40  ;;  %s483_s17 = sshll.u32 (!%p190_p9), %s652_s22, 3 }
   0xf   : > { %s439_s23 = sshll.u32 (!%p190_p9), %s213_s16, 3  ;;  %s557_s15 = scalar_lea.hbm (!%p190_p9), %s767_s5, 16 }
  0x13   : > { %v493_v0 = vld [vmem:[%s763_s1 + $0x38] sm:$0xff]  ;;  %vm283_vm0 = vcmask 261120   ;;  %v492_v2 = vld [vmem:[%s763_s1 + $0x30] sm:$0xff]  ;;  %v491_v4 = vld [vmem:[%s763_s1 + $0x28] sm:$0xff]  ;;  %s217_s30 = scalar_select %p216_p10, %s652_s22, 1 }
  0x14   : > { %v309_v1 = vsel %vm283_vm0, %v493_v0, 0  ;;  %v306_v3 = vsel %vm283_vm0, %v492_v2, 0  ;;  %v303_v5 = vsel %vm283_vm0, %v491_v4, 0  ;;  %v490_v6 = vld [vmem:[%s763_s1 + $0x20] sm:$0xff]  ;;  %v489_v8 = vld [vmem:[%s763_s1 + $0x18] sm:$0xff]  ;;  %v495_v10 = vld [vmem:[%s765_s3 + $0x8] sm:$0xff] }
  0x15   : > { %311 = vmatpush.bf16.xpose.msra.mxu0 %v309_v1  ;;  %v300_v7 = vsel %vm283_vm0, %v490_v6, 0  ;;  %v297_v9 = vsel %vm283_vm0, %v489_v8, 0  ;;  %v488_v11 = vld [vmem:[%s763_s1 + $0x10] sm:$0xff]  ;;  %352 = vmatpush.bf16.xpose.msra.mxu1 %v495_v10  ;;  %v487_v13 = vld [vmem:[%s763_s1 + $0x8] sm:$0xff]  ;;  %v486_v15 = vld [vmem:[%s763_s1] sm:$0xff]  ;;  %s440_s8 = sshll.u32 %s217_s30, 3  ;;  %s371_s30 = scalar_lea.hbm %s767_s5, %s483_s17 }
  0x16   : > { %v294_v12 = vsel %vm283_vm0, %v488_v11, 0  ;;  %v291_v14 = vsel %vm283_vm0, %v487_v13, 0  ;;  %v288_v16 = vsel %vm283_vm0, %v486_v15, 0  ;;  %s219_s11 = scalar_lea.vmem %s762_s0, %s440_s8  ;;  %v494_v19 = vld [vmem:[%s765_s3] sm:$0xff]  ;;  %s215_s8 = scalar_lea.vmem [#allocation2], %s439_s23 }
  0x17   : > { %v221_v17 = vld [vmem:[%s219_s11] sm:$0xff]  ;;  %s373_s9 = sshll.u32 %s215_s8, 4  ;;  %s375_s10 = sshll.u32 %s371_s30, 4  ;;  %s374_s9 = int_to_ptr.vmem [resolvable:$true] %s373_s9  ;;  %s376_s10 = int_to_ptr.hbm [resolvable:$true] %s375_s10 }
  0x18   : > { %v222_v18 = vpack.c.bf16 %v221_v17, %v221_v17  ;;  %v535_v20 = vld [vmem:[%s764_s2] ss:$0 sm:$0xff]  ;;  %s361_s22 = scalar_lea.sflag [#allocation3], %s213_s16  ;;  %s551_s11 = sshra.s32 %s376_s10, 4  ;;  %s552_s11 = int_to_ptr.hbm [resolvable:$true] %s551_s11 }
  0x19   : > { %v536_v26 = vld [vmem:[%s766_s4] ss:$0 sm:$0xff]  ;;  %s553_s12 = scalar_lea.hbm %s552_s11, 8  ;;  %p558_p0 = scmp.lt.s32.totalorder %s552_s11, %s767_s5 }
  0x1a   : > { %p554_p11 = scmp.ne.s32.totalorder %s552_s11, %s553_s12  ;;  %p559_p1 = scmp.lt.s32.totalorder %s557_s15, %s553_s12 }
  0x1c   : > { %p555_p12 = pnand %p554_p11, %p669_p5  ;;  %p560_p2 = por %p559_p1, %p558_p0 }
  0x1d   : > { %312 = vmatpush.bf16.xpose.msra.mxu0 %v306_v3  ;;  %353 = vmatpush.bf16.xpose.msra.mxu1 %v494_v19 }
  0x1e   : > { %p556_p13 = pneg %p555_p12 }
  0x20   : > { %p561_p3 = pnand %p560_p2, %p556_p13 }
  0x25   : > { %313 = vmatpush.bf16.xpose.msra.mxu0 %v303_v5 }
  0x2d   : > { %314 = vmatpush.bf16.xpose.msra.mxu0 %v300_v7 }
  0x35   : > { %315 = vmatpush.bf16.xpose.msra.mxu0 %v297_v9 }
  0x3d   : > { %316 = vmatpush.bf16.xpose.msra.mxu0 %v294_v12 }
  0x45   : > { %317 = vmatpush.bf16.xpose.msra.mxu0 %v291_v14 }
  0x4d   : > { %318 = vmatpush.bf16.xpose.msra.mxu0 %v288_v16 }
  0x54   : > { %473 = vmatmul.msk.bf16.vlgmr.msra.gmra.mxu0 %vm283_vm0, %v222_v18 }
  0xd1   : > { %v320_v21 = vpop.f32.mrf.mxu0 }
  0xd2   : > { %v321_v22 = vadd.f32 %v535_v20, %v320_v21 }
  0xd4   : > { %v324_v23 = vmax.f32 %v321_v22, 0.0 }
  0xd6   : > { %v325_v24 = vpack.c.bf16 %v324_v23, %v324_v23 }
  0xd8   : > { %354 = vmatmul.bf16.vlgmr.msra.gmra.mxu1 %v325_v24 }
  0xd9   : > { %v322_v25 = vpop.f32.mrf.mxu0 }
 0x155   : > { %v355_v27 = vpop.f32.mrf.mxu1 }
 0x156   : > { %v356_v28 = vadd.f32 %v536_v26, %v355_v27 }
 0x158   : > { %359 = vst.msk [vmem:[%s215_s8] sm:$0xff] %vm283_vm0, %v356_v28 }
 0x159   : > { %564 = shalt.err (!%p561_p3)
}
 0x15a   : > { %496 = dma.vmem_to_hbm [thread:$0]  (%p669_p5), %s374_s9, 128, %s376_s10, %s361_s22  }
 0x15d   : > { %v357_v29 = vpop.f32.mrf.mxu1 }
 0x15e PF: > { %p502_p4 = scmp.ge.s32.totalorder %s599_s21, 2  ;;  %s387_s16 = sand.u32 1, %s587_s18  }
 0x15f   : > { %s388_s25 = scalar_lea.sflag [#allocation3], %s387_s16 }
 0x160   : > { %p499_p7 = pnand %p502_p4, %p673_p6 }
 0x162   : > { %p500_p8 = pneg %p499_p7 }
 0x164   : > { %582 = dma.done.wait (%p500_p8), %s388_s25, 128  }
 0x165   : > { %584 = vsyncadd (%p500_p8), %s388_s25, 4294967168  ;;  %p15_p9 = scmp.ge.s32.totalorder %s656_s24, 4   ;;  %s770_s18 = smov %s591_s19 }
 0x166   : > { %s771_s19 = smov %s595_s20  ;;  %s772_s20 = smov %s667_s27 }
 0x167   : > { %s773_s21 = smov %s656_s24  ;;  %17 = sbr.rel (!%p15_p9) target bundleno = 3 (0x3), region = 75 }
 0x16c   :  { %394 = vsyncpa [#allocation3], 1 }
 0x16d   :  { %396 = vsyncpa [#allocation3 + $0x1], 1 }

</bundles_post_ra>
